<compile_context>
chip_gen: v7x
topology: tpu7x:2x2x1
jax: 0.10.0
libtpu: 0.0.40
codegen_flags: <defaults>
</compile_context>

<pallas_src>
import functools

import jax
import jax.numpy as jnp
from jax.experimental import pallas as pl
from jax.experimental.pallas import tpu as pltpu


# --------------------------------------------------------------------------------------
# kernel
# --------------------------------------------------------------------------------------
def _cpce_kernel(tril_ref, logits_ref, target_ref,
                 mle_ref, custom_ref, weight_ref,
                 acc_ref,
                 *, ignore_index, chunk, n_chunks, t_tile, seq_len, padded):
    t = pl.program_id(1)
    nt = pl.num_programs(1)

    # ---- per-batch init (the t axis is the sequential / reduction axis) ----
    @pl.when(t == 0)
    def _():
        mle_ref[...] = jnp.zeros_like(mle_ref)
        custom_ref[...] = jnp.zeros_like(custom_ref)
        weight_ref[...] = jnp.zeros_like(weight_ref)
        acc_ref[...] = jnp.zeros_like(acc_ref)   # row 0: carry, 1: nll gather, 2: penalty

    V = acc_ref.shape[1]

    tril = tril_ref[...]                                  # (chunk, chunk) bf16 strict tril
    ones8 = jnp.ones((8, chunk), jnp.bfloat16)            # column-total helper (MXU)
    vocab_iota = jax.lax.broadcasted_iota(jnp.int32, (chunk, V), 1)   # hoisted out of loop

    carry = acc_ref[pl.ds(0, 1), :]                       # (1, V) seen-token counts so far
    colg = jnp.zeros((1, V), jnp.float32)                 # gathered (x - m) at targets
    colc = jnp.zeros((1, V), jnp.float32)                 # unlikelihood column accumulator
    mle_part = jnp.float32(0.0)
    w_part = jnp.float32(0.0)

    for c in range(n_chunks):                             # static unroll; n_chunks is small
        c0 = c * chunk
        x = logits_ref[0, pl.ds(c0, chunk), :].astype(jnp.float32)   # (chunk, V) f32 math
        tgt = target_ref[0, pl.ds(c0, chunk), :]                     # (chunk, 1) int32

        # ---- softmax pieces: single exp pass, no dense lprobs / probs tensors ----
        m = jnp.max(x, axis=-1, keepdims=True)
        xm = x - m
        s = jnp.exp(xm)
        denom = jnp.sum(s, axis=-1, keepdims=True)
        logdenom = jnp.log(denom)

        valid = tgt != ignore_index                                   # (chunk, 1)
        # torch reference uses the literal -100 for the weight, independent of ignore_index
        not_pad = tgt != -100
        if padded:
            row_ids = (t * t_tile + c0
                       + jax.lax.broadcasted_iota(jnp.int32, (chunk, 1), 0))
            in_seq = row_ids < seq_len
            valid = jnp.logical_and(valid, in_seq)
            not_pad = jnp.logical_and(not_pad, in_seq)

        one_hot = jnp.logical_and(vocab_iota == tgt, valid)           # (chunk, V) bool
        oneh_bf = one_hot.astype(jnp.bfloat16)                        # exact 0/1, MXU-ready

        # ---- NLL:  sum(-lprobs[tgt]) = sum(valid * logdenom) - sum(one_hot * (x - m)) ----
        colg = colg + jnp.sum(jnp.where(one_hot, xm, 0.0), axis=0, keepdims=True)
        mle_part = mle_part + jnp.sum(valid.astype(jnp.float32) * logdenom)
        w_part = w_part + jnp.sum(not_pad.astype(jnp.float32))

        # ---- previous-context candidates: strict tril within the chunk + running carry ----
        prev = jnp.dot(tril, oneh_bf, preferred_element_type=jnp.float32)   # (chunk, V)
        appeared = (prev + carry) > 0.0
        neg = jnp.logical_and(appeared, jnp.logical_not(one_hot))
        if padded:
            neg = jnp.logical_and(neg, in_seq)

        # -log(clamp(1 - p, 1e-5)) == logdenom - log(max(denom - s, 1e-5 * denom))
        pen = logdenom - jnp.log(jnp.maximum(denom - s, 1e-5 * denom))
        colc = colc + jnp.sum(jnp.where(neg, pen, 0.0), axis=0, keepdims=True)

        # this chunk's token counts become "previous context" for later chunks / tiles
        # (column totals via a tiny MXU matmul: exact f32 counts, no full-tile f32 cast)
        tot8 = jnp.dot(ones8, oneh_bf, preferred_element_type=jnp.float32)  # (8, V) rows ==
        carry = carry + tot8[0:1, :]

    # one read-modify-write of each accumulator row per grid step (not per chunk)
    acc_ref[pl.ds(0, 1), :] = carry
    acc_ref[pl.ds(1, 1), :] = acc_ref[pl.ds(1, 1), :] + colg
    acc_ref[pl.ds(2, 1), :] = acc_ref[pl.ds(2, 1), :] + colc
    mle_ref[...] = mle_ref[...] + mle_part
    weight_ref[...] = weight_ref[...] + w_part

    # ---- final cross-lane collapse, once per batch ----
    @pl.when(t == nt - 1)
    def _():
        mle_ref[...] = mle_ref[...] - jnp.sum(acc_ref[pl.ds(1, 1), :])
        custom_ref[...] = custom_ref[...] + jnp.sum(acc_ref[pl.ds(2, 1), :])


# --------------------------------------------------------------------------------------
# tile / VMEM heuristics
# --------------------------------------------------------------------------------------
def _round_up(x, m):
    return ((x + m - 1) // m) * m


def _vmem_capacity_bytes():
    try:
        cap = int(getattr(pltpu.get_tpu_info(), "vmem_capacity_bytes", 0))
        if cap > 0:
            return cap
    except Exception:
        pass
    return 64 << 20            # conservative fallback: assume v7x-class (64 MiB) VMEM


def _min_sublane(itemsize):
    if itemsize >= 4:
        return 8
    if itemsize == 2:
        return 16
    return 32


def _vmem_estimate(t_tile, chunk, V, itemsize):
    return (2 * t_tile * V * itemsize      # double-buffered logits tile (native dtype)
            + 2 * t_tile * 128 * 4         # target tile (last dim lane-padded to 128)
            + 7 * chunk * V * 4            # live (chunk, V) f32/bf16/mask temporaries
            + 2 * chunk * chunk * 2        # bf16 strict-tril operand
            + 8 * V * 4                    # fused (8, V) f32 accumulator (sublane-padded)
            + (2 << 20))                   # outputs / slack / compiler internals


def _pick_chunk(t_tile, min_sub):
    if t_tile <= 128:                      # chunk cap = 128 keeps the tril matmul small
        return t_tile                      # enough that even the v5e MXU never binds
    for c in range(128, min_sub - 1, -min_sub):
        if t_tile % c == 0:
            return c
    return t_tile


def _pick_tiles(T, V, itemsize, budget):
    ms = _min_sublane(itemsize)
    t_max = min(_round_up(T, ms), 512)

    def candidates():
        for tT in range(t_max, ms - 1, -ms):
            for ch in range(min(tT, 128), ms - 1, -ms):
                if tT % ch == 0:
                    yield tT, ch

    # pass 1: small padding waste + fits budget; pass 2: drop the waste constraint
    for enforce_waste in (True, False):
        for tT, ch in candidates():
            waste = _round_up(T, tT) - T
            if enforce_waste and waste > max(ms, T // 8):
                continue
            if _vmem_estimate(tT, ch, V, itemsize) <= budget:
                return tT, ch
    return ms, ms


# --------------------------------------------------------------------------------------
# wrapper
# --------------------------------------------------------------------------------------
def candidate_penalty_cross_entropy(logits, target, rank_alpha=1.0,
                                    ignore_index=-100, return_ce=False,
                                    t_tile=None):
    """Forward pass of CandidatePenaltyCrossEntropyCriterion.

    logits: (B, T, V).  Pass in the model's native dtype (keep bf16 as bf16: the f32
            upcast happens per tile inside the kernel, halving HBM traffic on v5e).
    target: (B, T) int.
    """
    B, T, V = logits.shape
    itemsize = jnp.dtype(logits.dtype).itemsize
    min_sub = _min_sublane(itemsize)

    vmem_cap = _vmem_capacity_bytes()
    limit_cap = max(vmem_cap - (16 << 20), 32 << 20)      # headroom for compiler internals
    budget = (limit_cap * 3) // 4

    if t_tile is None:
        t_tile, chunk = _pick_tiles(T, V, itemsize, budget)
    else:
        t_tile = _round_up(int(t_tile), min_sub)
        chunk = _pick_chunk(t_tile, min_sub)
    n_chunks = t_tile // chunk

    est = _vmem_estimate(t_tile, chunk, V, itemsize)
    vmem_limit = int(min(limit_cap, max(32 << 20, 2 * est)))

    # Pad T up to a tile multiple; padded rows are masked out inside the kernel so no
    # tail tokens are silently dropped (and arbitrary user t_tile values are safe).
    T_pad = _round_up(T, t_tile)
    padded = T_pad != T
    tgt3 = target.astype(jnp.int32).reshape(B, T, 1)
    if padded:
        logits = jnp.pad(logits, ((0, 0), (0, T_pad - T), (0, 0)))
        tgt3 = jnp.pad(tgt3, ((0, 0), (0, T_pad - T), (0, 0)), constant_values=-100)
    nT = T_pad // t_tile

    # strict lower-triangular "is a previous position within this chunk" mask (bf16 0/1)
    row = jax.lax.broadcasted_iota(jnp.int32, (chunk, chunk), 0)
    col = jax.lax.broadcasted_iota(jnp.int32, (chunk, chunk), 1)
    tril = (col < row).astype(jnp.bfloat16)

    kernel = functools.partial(
        _cpce_kernel, ignore_index=ignore_index, chunk=chunk, n_chunks=n_chunks,
        t_tile=t_tile, seq_len=T, padded=padded)

    mle, custom, weight = pl.pallas_call(
        kernel,
        out_shape=(
            jax.ShapeDtypeStruct((B, 1, 1), jnp.float32),
            jax.ShapeDtypeStruct((B, 1, 1), jnp.float32),
            jax.ShapeDtypeStruct((B, 1, 1), jnp.float32),
        ),
        grid_spec=pltpu.PrefetchScalarGridSpec(
            num_scalar_prefetch=0,
            grid=(B, nT),
            in_specs=[
                pl.BlockSpec((chunk, chunk), lambda b, t: (0, 0)),     # tril (resident)
                pl.BlockSpec((1, t_tile, V), lambda b, t: (b, t, 0)),  # logits (native dtype)
                pl.BlockSpec((1, t_tile, 1), lambda b, t: (b, t, 0)),  # target ids
            ],
            out_specs=(
                pl.BlockSpec((1, 1, 1), lambda b, t: (b, 0, 0)),
                pl.BlockSpec((1, 1, 1), lambda b, t: (b, 0, 0)),
                pl.BlockSpec((1, 1, 1), lambda b, t: (b, 0, 0)),
            ),
            scratch_shapes=[
                # fused accumulator: row 0 = seen-token carry, row 1 = NLL gather,
                # row 2 = unlikelihood.  One (8, V) buffer costs what a single padded
                # (1, V) buffer costs, i.e. 1/3 of three separate scratch buffers.
                pltpu.VMEM((8, V), jnp.float32),
            ],
        ),
        compiler_params=pltpu.CompilerParams(
            # TODO(synk): for B == 1 on v7x (2 TCs) one core idles; a 2-way vocab split
            # with an online-softmax combine in the wrapper would recover it.
            dimension_semantics=("parallel", "arbitrary"),
            vmem_limit_bytes=vmem_limit),
    )(tril, logits, tgt3)

    mle_loss = jnp.sum(mle)
    custom_loss = jnp.sum(custom)
    w = jnp.sum(weight)
    loss = (mle_loss + rank_alpha * custom_loss) / w
    if return_ce:
        return loss, mle_loss / w
    return loss


# --------------------------------------------------------------------------------------
# pure-JAX reference (mirrors the PyTorch module)
# --------------------------------------------------------------------------------------
def _reference(logits, target, rank_alpha=1.0, ignore_index=-100):
    B, T, V = logits.shape
    lprobs = jax.nn.log_softmax(logits.astype(jnp.float32), -1)
    valid = target != ignore_index
    ntarget = jnp.where(valid, target + 1, 0)
    ctx = jnp.broadcast_to(ntarget[:, None, :], (B, T, T))
    ctx = jnp.where(jnp.tril(jnp.ones((T, T), bool), -1), ctx, 0)
    ctx = jnp.where(ctx == ntarget[:, :, None], 0, ctx)
    scat = jax.nn.one_hot(ctx, V + 1)                      # (B,T,T,V+1)
    neg = (jnp.sum(scat, axis=2) > 0).astype(jnp.float32)[..., 1:]
    oneh = jax.nn.one_hot(jnp.where(valid, target, 0), V) * valid[..., None]
    mle_loss = -jnp.sum(lprobs * oneh)
    one_minus_probs = jnp.maximum(1.0 - jnp.exp(lprobs), 1e-5)
    custom_loss = jnp.sum(-jnp.log(one_minus_probs) * neg)
    weight = jnp.sum(target != -100).astype(jnp.float32)
    return (mle_loss + rank_alpha * custom_loss) / weight


if __name__ == "__main__":
    key = jax.random.PRNGKey(0)

    def run_case(B, T, V, dtype, t_tile=None, tol=1e-4):
        k1, k2 = jax.random.split(jax.random.fold_in(key, T * 131 + V))
        logits = jax.random.normal(k1, (B, T, V), dtype=jnp.float32).astype(dtype)
        target = jax.random.randint(k2, (B, T), 0, V, dtype=jnp.int32)
        target = target.at[0, min(3, T - 1)].set(-100)
        if B > 1:
            target = target.at[1, min(6, T - 2)].set(-100)
        out = candidate_penalty_cross_entropy(logits, target, rank_alpha=1.0,
                                              t_tile=t_tile)
        out = jax.block_until_ready(out)
        ref = jax.block_until_ready(_reference(logits, target, rank_alpha=1.0))
        assert jnp.allclose(out, ref, rtol=tol, atol=tol), (B, T, V, str(dtype), out, ref)

    # small base case (single tile, single chunk)
    run_case(2, 8, 32, jnp.float32)
    # cross-tile carry (several T tiles)
    run_case(2, 64, 128, jnp.float32, t_tile=16)
    # intra-tile chunking (t_tile=256 -> 2 chunks of 128) + tail padding (T=200 -> 256)
    run_case(1, 200, 128, jnp.float32, t_tile=256)
    # bf16 logits stay bf16 end-to-end (f32 math on the tile in-kernel)
    run_case(2, 16, 64, jnp.bfloat16, tol=2e-3)

    print("KERNEL_OK")
</pallas_src>

<mosaic_0001>
module attributes {stable_mosaic.version = 11 : i64} {
  func.func @_cpce_kernel(%arg0: i32, %arg1: i32, %arg2: memref<8x8xbf16, #tpu.memory_space<vmem>>, %arg3: memref<1x8x32xf32, #tpu.memory_space<vmem>>, %arg4: memref<1x8x1xi32, #tpu.memory_space<vmem>>, %arg5: memref<1x1x1xf32, #tpu.memory_space<vmem>>, %arg6: memref<1x1x1xf32, #tpu.memory_space<vmem>>, %arg7: memref<1x1x1xf32, #tpu.memory_space<vmem>>, %arg8: memref<8x32xf32, #tpu.memory_space<vmem>>) attributes {dimension_semantics = [#tpu.dimension_semantics<parallel>, #tpu.dimension_semantics<arbitrary>], iteration_bounds = array<i64: 2, 1>, scalar_prefetch = 0 : i64, scratch_operands = 1 : i64, tpu.core_type = #tpu.core_type<tc>, window_params = [{pipeline_mode = #tpu.pipeline_mode<synchronous>, transform_indices = @transform_0, window_bounds = array<i64: 8, 8>}, {transform_indices = @transform_1, window_bounds = array<i64: 1, 8, 32>}, {transform_indices = @transform_2, window_bounds = array<i64: 1, 8, 1>}, {transform_indices = @transform_3, window_bounds = array<i64: 1, 1, 1>}, {transform_indices = @transform_4, window_bounds = array<i64: 1, 1, 1>}, {transform_indices = @transform_5, window_bounds = array<i64: 1, 1, 1>}]} {
    %c0_i32 = arith.constant 0 : i32
    %0 = arith.cmpi eq, %arg1, %c0_i32 : i32
    %1 = arith.extui %0 : i1 to i32
    %c0_i32_0 = arith.constant 0 : i32
    %2 = arith.cmpi ne, %1, %c0_i32_0 : i32
    scf.if %2 {
      %cst_50 = arith.constant 0.000000e+00 : f32
      %94 = vector.broadcast %cst_50 : f32 to vector<1x1x1xf32>
      %c0_51 = arith.constant 0 : index
      %c0_52 = arith.constant 0 : index
      %c0_53 = arith.constant 0 : index
      %95 = vector.load %arg5[%c0_51, %c0_52, %c0_53] : memref<1x1x1xf32, #tpu.memory_space<vmem>>, vector<1x1x1xf32>
      tpu.vector_store %arg5[%c0_51, %c0_52, %c0_53], %94 {strides = array<i32>} : memref<1x1x1xf32, #tpu.memory_space<vmem>>, vector<1x1x1xf32>,
      %cst_54 = arith.constant 0.000000e+00 : f32
      %96 = vector.broadcast %cst_54 : f32 to vector<1x1x1xf32>
      %c0_55 = arith.constant 0 : index
      %c0_56 = arith.constant 0 : index
      %c0_57 = arith.constant 0 : index
      %97 = vector.load %arg6[%c0_55, %c0_56, %c0_57] : memref<1x1x1xf32, #tpu.memory_space<vmem>>, vector<1x1x1xf32>
      tpu.vector_store %arg6[%c0_55, %c0_56, %c0_57], %96 {strides = array<i32>} : memref<1x1x1xf32, #tpu.memory_space<vmem>>, vector<1x1x1xf32>,
      %cst_58 = arith.constant 0.000000e+00 : f32
      %98 = vector.broadcast %cst_58 : f32 to vector<1x1x1xf32>
      %c0_59 = arith.constant 0 : index
      %c0_60 = arith.constant 0 : index
      %c0_61 = arith.constant 0 : index
      %99 = vector.load %arg7[%c0_59, %c0_60, %c0_61] : memref<1x1x1xf32, #tpu.memory_space<vmem>>, vector<1x1x1xf32>
      tpu.vector_store %arg7[%c0_59, %c0_60, %c0_61], %98 {strides = array<i32>} : memref<1x1x1xf32, #tpu.memory_space<vmem>>, vector<1x1x1xf32>,
      %cst_62 = arith.constant 0.000000e+00 : f32
      %100 = vector.broadcast %cst_62 : f32 to vector<8x32xf32>
      %c0_63 = arith.constant 0 : index
      %c0_64 = arith.constant 0 : index
      %101 = vector.load %arg8[%c0_63, %c0_64] : memref<8x32xf32, #tpu.memory_space<vmem>>, vector<8x32xf32>
      tpu.vector_store %arg8[%c0_63, %c0_64], %100 {strides = array<i32>} : memref<8x32xf32, #tpu.memory_space<vmem>>, vector<8x32xf32>,
    } else {
    }
    %c0 = arith.constant 0 : index
    %c0_1 = arith.constant 0 : index
    %3 = vector.load %arg2[%c0, %c0_1] : memref<8x8xbf16, #tpu.memory_space<vmem>>, vector<8x8xbf16>
    %cst = arith.constant 1.000000e+00 : bf16
    %4 = vector.broadcast %cst : bf16 to vector<8x8xbf16>
    %5 = tpu.iota {dimensions = array<i32: 1>} : vector<8x32xi32>
    %c0_2 = arith.constant 0 : index
    %c0_3 = arith.constant 0 : index
    %6 = vector.load %arg8[%c0_2, %c0_3] : memref<8x32xf32, #tpu.memory_space<vmem>>, vector<1x32xf32>
    %cst_4 = arith.constant 0.000000e+00 : f32
    %7 = vector.broadcast %cst_4 : f32 to vector<1x32xf32>
    %cst_5 = arith.constant 0.000000e+00 : f32
    %8 = vector.broadcast %cst_5 : f32 to vector<1x32xf32>
    %c0_6 = arith.constant 0 : index
    %c0_7 = arith.constant 0 : index
    %c0_8 = arith.constant 0 : index
    %9 = vector.load %arg3[%c0_6, %c0_7, %c0_8] : memref<1x8x32xf32, #tpu.memory_space<vmem>>, vector<1x8x32xf32>
    %10 = vector.shape_cast %9 : vector<1x8x32xf32> to vector<8x32xf32>
    %c0_9 = arith.constant 0 : index
    %c0_10 = arith.constant 0 : index
    %c0_11 = arith.constant 0 : index
    %11 = vector.load %arg4[%c0_9, %c0_10, %c0_11] : memref<1x8x1xi32, #tpu.memory_space<vmem>>, vector<1x8x1xi32>
    %12 = vector.shape_cast %11 : vector<1x8x1xi32> to vector<8x1xi32>
    %cst_12 = arith.constant dense<0xFF800000> : vector<8xf32>
    %13 = vector.multi_reduction <maximumf>, %10, %cst_12 [1] : vector<8x32xf32> to vector<8xf32>
    %14 = vector.shape_cast %13 : vector<8xf32> to vector<8x1xf32>
    %15 = vector.broadcast %14 : vector<8x1xf32> to vector<8x32xf32>
    %16 = arith.subf %10, %15 : vector<8x32xf32>
    %17 = math.exp %16 : vector<8x32xf32>
    %cst_13 = arith.constant dense<0.000000e+00> : vector<8xf32>
    %18 = vector.multi_reduction <add>, %17, %cst_13 [1] : vector<8x32xf32> to vector<8xf32>
    %19 = vector.shape_cast %18 : vector<8xf32> to vector<8x1xf32>
    %20 = math.log %19 : vector<8x1xf32>
    %c-100_i32 = arith.constant -100 : i32
    %21 = vector.broadcast %c-100_i32 : i32 to vector<8x1xi32>
    %22 = arith.cmpi ne, %12, %21 : vector<8x1xi32>
    %c-100_i32_14 = arith.constant -100 : i32
    %23 = vector.broadcast %c-100_i32_14 : i32 to vector<8x1xi32>
    %24 = arith.cmpi ne, %12, %23 : vector<8x1xi32>
    %25 = vector.broadcast %12 : vector<8x1xi32> to vector<8x32xi32>
    %26 = arith.cmpi eq, %5, %25 : vector<8x32xi32>
    %27 = vector.broadcast %22 : vector<8x1xi1> to vector<8x32xi1>
    %28 = arith.andi %26, %27 : vector<8x32xi1>
    %29 = arith.extui %28 : vector<8x32xi1> to vector<8x32xi32>
    %30 = arith.sitofp %29 : vector<8x32xi32> to vector<8x32xf32>
    %31 = arith.truncf %30 : vector<8x32xf32> to vector<8x32xbf16>
    %cst_15 = arith.constant 0.000000e+00 : f32
    %32 = vector.broadcast %cst_15 : f32 to vector<8x32xf32>
    %33 = arith.select %28, %16, %32 : vector<8x32xi1>, vector<8x32xf32>
    %cst_16 = arith.constant dense<0.000000e+00> : vector<32xf32>
    %34 = vector.multi_reduction <add>, %33, %cst_16 [0] : vector<8x32xf32> to vector<32xf32>
    %35 = vector.shape_cast %34 : vector<32xf32> to vector<1x32xf32>
    %36 = arith.addf %7, %35 : vector<1x32xf32>
    %37 = arith.extui %22 : vector<8x1xi1> to vector<8x1xi32>
    %38 = arith.sitofp %37 : vector<8x1xi32> to vector<8x1xf32>
    %39 = arith.mulf %38, %20 : vector<8x1xf32>
    %40 = vector.shape_cast %39 : vector<8x1xf32> to vector<1x8x1xf32>
    %cst_17 = arith.constant dense<0.000000e+00> : vector<1xf32>
    %41 = vector.multi_reduction <add>, %40, %cst_17 [1, 2] : vector<1x8x1xf32> to vector<1xf32>
    %42 = vector.shape_cast %41 : vector<1xf32> to vector<1x1x1xf32>
    %43 = vector.extract %42[0, 0, 0] : f32 from vector<1x1x1xf32>
    %cst_18 = arith.constant 0.000000e+00 : f32
    %44 = arith.addf %cst_18, %43 : f32
    %45 = arith.extui %24 : vector<8x1xi1> to vector<8x1xi32>
    %46 = arith.sitofp %45 : vector<8x1xi32> to vector<8x1xf32>
    %47 = vector.shape_cast %46 : vector<8x1xf32> to vector<1x8x1xf32>
    %cst_19 = arith.constant dense<0.000000e+00> : vector<1xf32>
    %48 = vector.multi_reduction <add>, %47, %cst_19 [1, 2] : vector<1x8x1xf32> to vector<1xf32>
    %49 = vector.shape_cast %48 : vector<1xf32> to vector<1x1x1xf32>
    %50 = vector.extract %49[0, 0, 0] : f32 from vector<1x1x1xf32>
    %cst_20 = arith.constant 0.000000e+00 : f32
    %51 = arith.addf %cst_20, %50 : f32
    %cst_21 = arith.constant dense<0.000000e+00> : vector<8x32xf32>
    %52 = tpu.matmul %3, %31, %cst_21 {dimension_numbers = #tpu.dot_dimension_numbers<[1], [0], [0], [1], [0, 0, 1, 1], [], []>} : vector<8x8xbf16>, vector<8x32xbf16>, vector<8x32xf32> -> vector<8x32xf32>
    %53 = vector.broadcast %6 : vector<1x32xf32> to vector<8x32xf32>
    %54 = arith.addf %52, %53 : vector<8x32xf32>
    %cst_22 = arith.constant 0.000000e+00 : f32
    %55 = vector.broadcast %cst_22 : f32 to vector<8x32xf32>
    %56 = arith.cmpf ogt, %54, %55 : vector<8x32xf32>
    %cst_23 = arith.constant dense<true> : vector<8x32xi1>
    %57 = arith.xori %28, %cst_23 : vector<8x32xi1>
    %58 = arith.andi %56, %57 : vector<8x32xi1>
    %59 = vector.broadcast %19 : vector<8x1xf32> to vector<8x32xf32>
    %60 = arith.subf %59, %17 : vector<8x32xf32>
    %cst_24 = arith.constant 9.99999974E-6 : f32
    %61 = vector.broadcast %cst_24 : f32 to vector<8x1xf32>
    %62 = arith.mulf %61, %19 : vector<8x1xf32>
    %63 = vector.broadcast %62 : vector<8x1xf32> to vector<8x32xf32>
    %64 = arith.maximumf %60, %63 : vector<8x32xf32>
    %65 = math.log %64 : vector<8x32xf32>
    %66 = vector.broadcast %20 : vector<8x1xf32> to vector<8x32xf32>
    %67 = arith.subf %66, %65 : vector<8x32xf32>
    %cst_25 = arith.constant 0.000000e+00 : f32
    %68 = vector.broadcast %cst_25 : f32 to vector<8x32xf32>
    %69 = arith.select %58, %67, %68 : vector<8x32xi1>, vector<8x32xf32>
    %cst_26 = arith.constant dense<0.000000e+00> : vector<32xf32>
    %70 = vector.multi_reduction <add>, %69, %cst_26 [0] : vector<8x32xf32> to vector<32xf32>
    %71 = vector.shape_cast %70 : vector<32xf32> to vector<1x32xf32>
    %72 = arith.addf %8, %71 : vector<1x32xf32>
    %cst_27 = arith.constant dense<0.000000e+00> : vector<8x32xf32>
    %73 = tpu.matmul %4, %31, %cst_27 {dimension_numbers = #tpu.dot_dimension_numbers<[1], [0], [0], [1], [0, 0, 1, 1], [], []>} : vector<8x8xbf16>, vector<8x32xbf16>, vector<8x32xf32> -> vector<8x32xf32>
    %74 = vector.extract_strided_slice %73 {offsets = [0, 0], sizes = [1, 32], strides = [1, 1]} : vector<8x32xf32> to vector<1x32xf32>
    %75 = arith.addf %6, %74 : vector<1x32xf32>
    %c0_28 = arith.constant 0 : index
    %c0_29 = arith.constant 0 : index
    %76 = vector.load %arg8[%c0_28, %c0_29] : memref<8x32xf32, #tpu.memory_space<vmem>>, vector<1x32xf32>
    tpu.vector_store %arg8[%c0_28, %c0_29], %75 {strides = array<i32>} : memref<8x32xf32, #tpu.memory_space<vmem>>, vector<1x32xf32>,
    %c1 = arith.constant 1 : index
    %c0_30 = arith.constant 0 : index
    %77 = vector.load %arg8[%c1, %c0_30] : memref<8x32xf32, #tpu.memory_space<vmem>>, vector<1x32xf32>
    %78 = arith.addf %77, %36 : vector<1x32xf32>
    %c1_31 = arith.constant 1 : index
    %c0_32 = arith.constant 0 : index
    %79 = vector.load %arg8[%c1_31, %c0_32] : memref<8x32xf32, #tpu.memory_space<vmem>>, vector<1x32xf32>
    tpu.vector_store %arg8[%c1_31, %c0_32], %78 {strides = array<i32>} : memref<8x32xf32, #tpu.memory_space<vmem>>, vector<1x32xf32>,
    %c2 = arith.constant 2 : index
    %c0_33 = arith.constant 0 : index
    %80 = vector.load %arg8[%c2, %c0_33] : memref<8x32xf32, #tpu.memory_space<vmem>>, vector<1x32xf32>
    %81 = arith.addf %80, %72 : vector<1x32xf32>
    %c2_34 = arith.constant 2 : index
    %c0_35 = arith.constant 0 : index
    %82 = vector.load %arg8[%c2_34, %c0_35] : memref<8x32xf32, #tpu.memory_space<vmem>>, vector<1x32xf32>
    tpu.vector_store %arg8[%c2_34, %c0_35], %81 {strides = array<i32>} : memref<8x32xf32, #tpu.memory_space<vmem>>, vector<1x32xf32>,
    %c0_36 = arith.constant 0 : index
    %c0_37 = arith.constant 0 : index
    %c0_38 = arith.constant 0 : index
    %83 = vector.load %arg5[%c0_36, %c0_37, %c0_38] : memref<1x1x1xf32, #tpu.memory_space<vmem>>, vector<1x1x1xf32>
    %84 = vector.broadcast %44 : f32 to vector<1x1x1xf32>
    %85 = arith.addf %83, %84 : vector<1x1x1xf32>
    %c0_39 = arith.constant 0 : index
    %c0_40 = arith.constant 0 : index
    %c0_41 = arith.constant 0 : index
    %86 = vector.load %arg5[%c0_39, %c0_40, %c0_41] : memref<1x1x1xf32, #tpu.memory_space<vmem>>, vector<1x1x1xf32>
    tpu.vector_store %arg5[%c0_39, %c0_40, %c0_41], %85 {strides = array<i32>} : memref<1x1x1xf32, #tpu.memory_space<vmem>>, vector<1x1x1xf32>,
    %c0_42 = arith.constant 0 : index
    %c0_43 = arith.constant 0 : index
    %c0_44 = arith.constant 0 : index
    %87 = vector.load %arg7[%c0_42, %c0_43, %c0_44] : memref<1x1x1xf32, #tpu.memory_space<vmem>>, vector<1x1x1xf32>
    %88 = vector.broadcast %51 : f32 to vector<1x1x1xf32>
    %89 = arith.addf %87, %88 : vector<1x1x1xf32>
    %c0_45 = arith.constant 0 : index
    %c0_46 = arith.constant 0 : index
    %c0_47 = arith.constant 0 : index
    %90 = vector.load %arg7[%c0_45, %c0_46, %c0_47] : memref<1x1x1xf32, #tpu.memory_space<vmem>>, vector<1x1x1xf32>
    tpu.vector_store %arg7[%c0_45, %c0_46, %c0_47], %89 {strides = array<i32>} : memref<1x1x1xf32, #tpu.memory_space<vmem>>, vector<1x1x1xf32>,
    %c0_i32_48 = arith.constant 0 : i32
    %91 = arith.cmpi eq, %arg1, %c0_i32_48 : i32
    %92 = arith.extui %91 : i1 to i32
    %c0_i32_49 = arith.constant 0 : i32
    %93 = arith.cmpi ne, %92, %c0_i32_49 : i32
    scf.if %93 {
      %c0_50 = arith.constant 0 : index
      %c0_51 = arith.constant 0 : index
      %c0_52 = arith.constant 0 : index
      %94 = vector.load %arg5[%c0_50, %c0_51, %c0_52] : memref<1x1x1xf32, #tpu.memory_space<vmem>>, vector<1x1x1xf32>
      %c1_53 = arith.constant 1 : index
      %c0_54 = arith.constant 0 : index
      %95 = vector.load %arg8[%c1_53, %c0_54] : memref<8x32xf32, #tpu.memory_space<vmem>>, vector<1x32xf32>
      %96 = vector.shape_cast %95 : vector<1x32xf32> to vector<1x1x32xf32>
      %cst_55 = arith.constant dense<0.000000e+00> : vector<1xf32>
      %97 = vector.multi_reduction <add>, %96, %cst_55 [1, 2] : vector<1x1x32xf32> to vector<1xf32>
      %98 = vector.shape_cast %97 : vector<1xf32> to vector<1x1x1xf32>
      %99 = vector.extract %98[0, 0, 0] : f32 from vector<1x1x1xf32>
      %100 = vector.broadcast %99 : f32 to vector<1x1x1xf32>
      %101 = arith.subf %94, %100 : vector<1x1x1xf32>
      %c0_56 = arith.constant 0 : index
      %c0_57 = arith.constant 0 : index
      %c0_58 = arith.constant 0 : index
      %102 = vector.load %arg5[%c0_56, %c0_57, %c0_58] : memref<1x1x1xf32, #tpu.memory_space<vmem>>, vector<1x1x1xf32>
      tpu.vector_store %arg5[%c0_56, %c0_57, %c0_58], %101 {strides = array<i32>} : memref<1x1x1xf32, #tpu.memory_space<vmem>>, vector<1x1x1xf32>,
      %c0_59 = arith.constant 0 : index
      %c0_60 = arith.constant 0 : index
      %c0_61 = arith.constant 0 : index
      %103 = vector.load %arg6[%c0_59, %c0_60, %c0_61] : memref<1x1x1xf32, #tpu.memory_space<vmem>>, vector<1x1x1xf32>
      %c2_62 = arith.constant 2 : index
      %c0_63 = arith.constant 0 : index
      %104 = vector.load %arg8[%c2_62, %c0_63] : memref<8x32xf32, #tpu.memory_space<vmem>>, vector<1x32xf32>
      %105 = vector.shape_cast %104 : vector<1x32xf32> to vector<1x1x32xf32>
      %cst_64 = arith.constant dense<0.000000e+00> : vector<1xf32>
      %106 = vector.multi_reduction <add>, %105, %cst_64 [1, 2] : vector<1x1x32xf32> to vector<1xf32>
      %107 = vector.shape_cast %106 : vector<1xf32> to vector<1x1x1xf32>
      %108 = vector.extract %107[0, 0, 0] : f32 from vector<1x1x1xf32>
      %109 = vector.broadcast %108 : f32 to vector<1x1x1xf32>
      %110 = arith.addf %103, %109 : vector<1x1x1xf32>
      %c0_65 = arith.constant 0 : index
      %c0_66 = arith.constant 0 : index
      %c0_67 = arith.constant 0 : index
      %111 = vector.load %arg6[%c0_65, %c0_66, %c0_67] : memref<1x1x1xf32, #tpu.memory_space<vmem>>, vector<1x1x1xf32>
      tpu.vector_store %arg6[%c0_65, %c0_66, %c0_67], %110 {strides = array<i32>} : memref<1x1x1xf32, #tpu.memory_space<vmem>>, vector<1x1x1xf32>,
    } else {
    }
    return
  }
  func.func @transform_0(%arg0: i32, %arg1: i32) -> (i32, i32) {
    %c0_i32 = arith.constant 0 : i32
    %c0_i32_0 = arith.constant 0 : i32
    %c0_i32_1 = arith.constant 0 : i32
    return %c0_i32, %c0_i32_0 : i32, i32
  }
  func.func @transform_1(%arg0: i32, %arg1: i32) -> (i32, i32, i32) {
    %c0_i32 = arith.constant 0 : i32
    %c0_i32_0 = arith.constant 0 : i32
    return %arg0, %arg1, %c0_i32 : i32, i32, i32
  }
  func.func @transform_2(%arg0: i32, %arg1: i32) -> (i32, i32, i32) {
    %c0_i32 = arith.constant 0 : i32
    %c0_i32_0 = arith.constant 0 : i32
    return %arg0, %arg1, %c0_i32 : i32, i32, i32
  }
  func.func @transform_3(%arg0: i32, %arg1: i32) -> (i32, i32, i32) {
    %c0_i32 = arith.constant 0 : i32
    %c0_i32_0 = arith.constant 0 : i32
    %c0_i32_1 = arith.constant 0 : i32
    return %arg0, %c0_i32, %c0_i32_0 : i32, i32, i32
  }
  func.func @transform_4(%arg0: i32, %arg1: i32) -> (i32, i32, i32) {
    %c0_i32 = arith.constant 0 : i32
    %c0_i32_0 = arith.constant 0 : i32
    %c0_i32_1 = arith.constant 0 : i32
    return %arg0, %c0_i32, %c0_i32_0 : i32, i32, i32
  }
  func.func @transform_5(%arg0: i32, %arg1: i32) -> (i32, i32, i32) {
    %c0_i32 = arith.constant 0 : i32
    %c0_i32_0 = arith.constant 0 : i32
    %c0_i32_1 = arith.constant 0 : i32
    return %arg0, %c0_i32, %c0_i32_0 : i32, i32, i32
  }
}

</mosaic_0001>

<bundles_post_ra>
// kernel: tpu_custom_call.1
= control target key start
LH: loop header
LB: loop body
LE: loop exit
PB: predicated region body
PF: predicated region fallthrough
CT: control target
= control target key end

     0   :  { %s783_s18 = smov 0   ;;  %s785_s19 = smov 0   ;;  %s894_s0 = inlined_call_operand.vmem [shape: bf16[8,8], index: 0, kind: input, shape index: {}]   ;;  %s895_s1 = inlined_call_operand.vmem [shape: f32[2,8,32], index: 1, kind: input, shape index: {}]   ;;  %s896_s2 = inlined_call_operand.vmem [shape: s32[2,8,1], index: 2, kind: input, shape index: {}]   ;;  %s897_s3 = inlined_call_operand.vmem [shape: f32[2,1,1], index: 3, kind: output, shape index: {0}]   ;;  %s898_s4 = inlined_call_operand.vmem [shape: f32[2,1,1], index: 4, kind: output, shape index: {1}]   ;;  %s899_s5 = inlined_call_operand.vmem [shape: f32[2,1,1], index: 5, kind: output, shape index: {2}]  }
   0x1   :  { %s787_s20 = smov 0  }
   0x2 LB: > { %s28_s21 = sadd.s32 1, %s742_s19  ;;  %p655_p0 = scmp.ge.s32.totalorder %s746_s20, 1  ;;  %s746_s20 = sphi %s787_s20, %s16_s20   ;;  %s742_s19 = sphi %s785_s19, %s903_s19   ;;  %s738_s18 = sphi %s783_s18, %s902_s18  }
   0x3   : > { %p30_p1 = scmp.ge.s32.totalorder %s28_s21, 2  ;;  %p222_p2 = scmp.lt.s32.totalorder %s746_s20, 3 }
   0x5   : > { %s905_s21 = smov (%p30_p1, %s28_s21), 0  ;;  %p223_p3 = pnand %p655_p0, %p222_p2 }
   0x6   : > { %p263_p4 = scmp.lt.s32.totalorder (!%p223_p3), %s738_s18, 1  ;;  %vm296_vm0 = vcmask (!%p223_p3), 261120   ;;  %v748_v0 = vmov (!%p223_p3), 0   ;;  %v749_v1 = vmov (!%p223_p3), 0.0   ;;  %vm750_vm2 = vmmov (!%p223_p3), 0  }
   0x7   : > { %226 = sbr.rel (%p223_p3) target bundleno = 608 (0x260), region = 32  ;;  %717 = vset.pattern.permute.xlu0 (!%p223_p3), %v748_v0  ;;  %297 = vst.msk [vmem:[#allocation2] sm:$0xff] (!%p223_p3), %vm296_vm0, %v749_v1  ;;  %668 = vmatprep.subr.bf16.mxu0 (!%p223_p3), %v749_v1  ;;  %v299_v6 = vlaneseq (!%p223_p3)  ;;  %vm372_vm6 = vcmask (!%p223_p3), 1043456   ;;  %v298_v14 = vld [vmem:[%s894_s0] sm:$0xf] (!%p223_p3)  ;;  %vm368_vm7 = vcmask (!%p223_p3), 64512  }
   0x8   : > { %674 = vmatprep.subr.bf16.mxu1 (!%p223_p3), %v749_v1  ;;  %670 = vmatprep.mubr.msk.bf16.mxu0 (!%p223_p3), %vm750_vm2, %v749_v1  ;;  %vm341_vm8 = vcmask (!%p223_p3), 7168   ;;  %vm478_vm9 = vcmask (!%p223_p3), 253952   ;;  %v751_v34 = vmov (!%p223_p3), 1065369472   ;;  %vm292_vm10 = vcmask (!%p223_p3), 0  }
   0x9   : > { %676 = vmatprep.mubr.msk.bf16.mxu1 (!%p223_p3), %vm750_vm2, %v749_v1  ;;  %v300_v8 = vand.u32 (!%p223_p3), 127, %v299_v6  ;;  %v365_v43 = vshrl.u32 (!%p223_p3), %v299_v6, 7  ;;  %vm752_vm12 = vmmov (!%p223_p3), 1  }
   0xb   : > { %v366_v44 = vsub.s32 (!%p223_p3), 0, %v365_v43 }
   0xe   : > { %s907_s18 = smov (!%p263_p4, %s738_s18), 1  ;;  %v480_v25 = vld [vmem:[#allocation2 + $0x1] sm:$0x1]  ;;  %v301_v45 = vld [vmem:[#allocation2] sm:$0x1] }
   0xf   : > { %s656_s22 = sshll.u32 %s907_s18, 3  ;;  %s844_s8 = scalar_lea.vmem %s897_s3, %s907_s18  ;;  %v367_v47 = vrot.slane %v301_v45, %v366_v44  ;;  %v483_v62 = vld [vmem:[#allocation2 + $0x2] sm:$0x1] }
  0x10   : > { %s276_s25 = scalar_lea.vmem %s896_s2, %s656_s22  ;;  %s269_s28 = scalar_lea.vmem %s895_s1, %s656_s22  ;;  %293 = vst.msk [vmem:[%s844_s8] sm:$0x1] %vm292_vm10, %v749_v1 }
  0x11   : > { %v303_v2 = vld [vmem:[%s276_s25] sm:$0xff]  ;;  %s858_s11 = scalar_lea.vmem %s899_s5, %s907_s18  ;;  %s867_s14 = scalar_lea.vmem %s898_s4, %s907_s18 }
  0x12   : > { %v302_v3 = vld [vmem:[%s269_s28] sm:$0xff]  ;;  %318 = vperm.xlu0 %717, %v303_v2   ;;  %vm316_vm1 = vcmp.ne.s32.totalorder %v303_v2, 4294967196  ;;  %295 = vst.msk [vmem:[%s858_s11] sm:$0x1] %vm292_vm10, %v749_v1  ;;  %294 = vst.msk [vmem:[%s867_s14] sm:$0x1] %vm292_vm10, %v749_v1 }
  0x13   : > { %v305_v4 = vsel %vm296_vm0, %v302_v3, -inf  ;;  %v321_v5 = vsel %vm316_vm1, 1, %v748_v0  ;;  %v659_v28 = vsel %vm316_vm1, 1.0, %v749_v1 }
  0x14   : > { %306 = vmax.xlane.f32.xlu1 %v305_v4  ;;  %v353_v31 = vsel %vm341_vm8, %v659_v28, 0.0 }
  0x16   : > { %323 = vperm.xlu0 %717, %v321_v5  }
  0x91   : > { %v319_v7 = vpop.permute.xlu0 %318 }
  0x92   : > { %vm320_vm3 = vcmp.eq.s32.totalorder %v300_v8, %v319_v7 }
  0x95   : > { %v324_v9 = vpop.permute.xlu0 %323 }
  0x96   : > { %vm325_vm4 = vcmp.eq.s32.totalorder %v324_v9, 1 }
  0x97   : > { %vm818_vm5 = vmand %vm320_vm3, %vm325_vm4 }
  0x98   : > { %v658_v11 = vsel %vm818_vm5, 1.0, %v749_v1  ;;  %vm417_vm13 = vmxor %vm818_vm5, %vm752_vm12 }
  0x99   : > { %v329_v12 = vpack.c.bf16 %v658_v11, %v658_v11 }
  0x9b   : > { %v374_v13 = vsel %vm372_vm6, %v329_v12, 0 }
  0x9c   : > { %669 = vmatpush3.bf16.msra.mxu0 %v374_v13  ;;  %675 = vmatpush3.bf16.msra.mxu1 %v374_v13 }
  0x9f   : > { %671 = vmatmul.mubr.msk.bf16.vlgmr.msra.gmra.mrb[0].mxu0 %vm368_vm7, %v298_v14  ;;  %677 = vmatmul.mubr.msk.bf16.vlgmr.msra.gmra.mrb[0].mxu1 %vm368_vm7, %v751_v34 }
  0xa1   : > { %v307_v15 = vpop.xlane.xlu1 %306 }
  0xa2   : > { %v308_v16 = vsub.f32 %v302_v3, %v307_v15 }
  0xa4   : > { %v309_v17 = vmul.f32 1.442695, %v308_v16  ;;  %v330_v18 = vsel %vm818_vm5, %v308_v16, 0.0 }
  0xa5   : > { %v331_v19 = vsel %vm296_vm0, %v330_v18, 0.0 }
  0xa6   : > { %718 = vpow2.f32 %v309_v17  ;;  %v332_v20 = vrot.slane %v331_v19, 4 }
  0xa8   : > { %v333_v21 = vadd.f32 %v332_v20, %v331_v19 }
  0xaa   : > { %v334_v22 = vrot.slane %v333_v21, 2 }
  0xac   : > { %v335_v23 = vadd.f32 %v334_v22, %v333_v21 }
  0xae   : > { %v336_v24 = vrot.slane %v335_v23, 1 }
  0xb0   : > { %v719_v26 = vpop.eup %718  ;;  %v337_v27 = vadd.f32 %v336_v24, %v335_v23 }
  0xb1   : > { %v311_v29 = vsel %vm296_vm0, %v719_v26, 0.0 }
  0xb2   : > { %v481_v30 = vadd.f32 %v480_v25, %v337_v27  ;;  %312 = vadd.xlane.f32.xlu1 %v311_v29  ;;  %v486_v29 = vld [vmem:[%s844_s8] sm:$0x1] }
  0xb4   : > { %482 = vst.msk [vmem:[#allocation2 + $0x1] sm:$0x1] %vm478_vm9, %v481_v30  ;;  %v491_v30 = vld [vmem:[%s858_s11] sm:$0x1] }
  0xb6   : > { %354 = vadd.xlane.f32.xlu1 %v353_v31 }
  0xbb   : > { %v499_v32 = vld [vmem:[#allocation2 + $0x1] sm:$0x1] }
  0xbc   : > { %v500_v33 = vsel %vm478_vm9, %v499_v32, 0.0 }
  0xbd   : > { %501 = vadd.xlane.f32.xlu1 %v500_v33 }
 0x13f   : > { %v313_v35 = vpop.xlane.xlu1 %312 }
 0x140   : > { %720 = vlog2.f32 %v313_v35  ;;  %v419_v40 = vsub.f32 %v313_v35, %v719_v26  ;;  %v420_v41 = vmul.f32 1e-05, %v313_v35 }
 0x142   : > { %v421_v42 = vmax.f32 %v419_v40, %v420_v41 }
 0x143   : > { %v355_v4 = vpop.xlane.xlu1 %354 }
 0x144   : > { %722 = vlog2.f32 %v421_v42  ;;  %v356_v5 = vrot.slane %v355_v4, 4 }
 0x146   : > { %v357_v8 = vadd.f32 %v356_v5, %v355_v4 }
 0x148   : > { %v358_v11 = vrot.slane %v357_v8, 2 }
 0x14a   : > { %v721_v36 = vpop.eup %720  ;;  %v502_v6 = vpop.xlane.xlu1 %501  ;;  %v359_v19 = vadd.f32 %v358_v11, %v357_v8 }
 0x14b   : > { %v315_v37 = vmul.f32 0.6931472, %v721_v36  ;;  %v503_v7 = vrot.slane %v502_v6, 4 }
 0x14c   : > { %v360_v22 = vrot.slane %v359_v19, 1 }
 0x14d   : > { %v340_v38 = vmul.f32 %v659_v28, %v315_v37  ;;  %v504_v9 = vadd.f32 %v503_v7, %v502_v6 }
 0x14e   : > { %v723_v46 = vpop.eup %722  ;;  %v361_v26 = vadd.f32 %v360_v22, %v359_v19 }
 0x14f   : > { %v342_v39 = vsel %vm341_vm8, %v340_v38, 0.0  ;;  %v423_v48 = vmul.f32 0.6931472, %v723_v46  ;;  %v505_v17 = vrot.slane %v504_v9, 2 }
 0x150   : > { %343 = vadd.xlane.f32.xlu0 %v342_v39 }
 0x151   : > { %v424_v53 = vsub.f32 %v315_v37, %v423_v48  ;;  %v506_v21 = vadd.f32 %v505_v17, %v504_v9 }
 0x153   : > { %v507_v25 = vrot.slane %v506_v21, 1 }
 0x155   : > { %v508_v28 = vadd.f32 %v507_v25, %v506_v21 }
 0x172   : > { %v410_v49 = vpop.f32.mrb[0].mxu0  ;;  %v471_v10 = vpop.f32.mrb[0].mxu1 }
 0x173   : > { %v411_v50 = vadd.f32 %v410_v49, %v367_v47  ;;  %v672_v51 = vpop.f32.mrb[1].mxu0  ;;  %v477_v12 = vadd.f32 %v471_v10, %v301_v45  ;;  %v678_v13 = vpop.f32.mrb[1].mxu1  ;;  %v513_v45 = vld [vmem:[%s867_s14] sm:$0x1] }
 0x174   : > { %v413_v52 = vpop.f32.mrb[2].mxu0  ;;  %v474_v14 = vpop.f32.mrb[2].mxu1 }
 0x175   : > { %vm416_vm11 = vcmp.gt.f32.partialorder %v411_v50, 0.0  ;;  %v673_v54 = vpop.f32.mrb[3].mxu0  ;;  %479 = vst.msk [vmem:[#allocation2] sm:$0x1] %vm478_vm9, %v477_v12  ;;  %v679_v16 = vpop.f32.mrb[3].mxu1 }
 0x176   : > { %vm418_vm14 = vmand %vm416_vm11, %vm417_vm13 }
 0x177   : > { %v425_v55 = vsel %vm418_vm14, %v424_v53, 0.0 }
 0x178   : > { %v426_v56 = vsel %vm296_vm0, %v425_v55, 0.0 }
 0x179   : > { %v427_v57 = vrot.slane %v426_v56, 4 }
 0x17b   : > { %v428_v58 = vadd.f32 %v427_v57, %v426_v56 }
 0x17d   : > { %v429_v59 = vrot.slane %v428_v58, 2 }
 0x17f   : > { %v430_v60 = vadd.f32 %v429_v59, %v428_v58 }
 0x181   : > { %v431_v61 = vrot.slane %v430_v60, 1 }
 0x183   : > { %v432_v63 = vadd.f32 %v431_v61, %v430_v60 }
 0x185   : > { %v484_v0 = vadd.f32 %v483_v62, %v432_v63 }
 0x187   : > { %485 = vst.msk [vmem:[#allocation2 + $0x2] sm:$0x1] %vm478_vm9, %v484_v0 }
 0x18e   : > { %v514_v2 = vld [vmem:[#allocation2 + $0x2] sm:$0x1] }
 0x18f   : > { %v515_v3 = vsel %vm478_vm9, %v514_v2, 0.0 }
 0x190   : > { %516 = vadd.xlane.f32.xlu1 %v515_v3 }
 0x1dd   : > { %v344_v15 = vpop.xlane.xlu0 %343 }
 0x1de   : > { %v345_v18 = vrot.slane %v344_v15, 4 }
 0x1e0   : > { %v346_v1 = vadd.f32 %v345_v18, %v344_v15 }
 0x1e2   : > { %v347_v20 = vrot.slane %v346_v1, 2 }
 0x1e4   : > { %v348_v23 = vadd.f32 %v347_v20, %v346_v1 }
 0x1e6   : > { %v349_v24 = vrot.slane %v348_v23, 1 }
 0x1e8   : > { %v350_v27 = vadd.f32 %v349_v24, %v348_v23 }
 0x1ea   : > { %680 = vpush %v350_v27 }
 0x1eb   : > { %682 = vpush %v361_v26 }
 0x1ec   : > { %684 = vpush %v508_v28 }
 0x21b   : > { %s681_s15 = spop %680 }
 0x21c   : > { %v487_v31 = vstv %s681_s15  ;;  %s683_s16 = spop %682 }
 0x21d   : > { %v488_v32 = vadd.f32 %v487_v31, %v486_v29  ;;  %v492_v33 = vstv %s683_s16  ;;  %v517_v35 = vpop.xlane.xlu1 %516  ;;  %s685_s17 = spop %684 }
 0x21e   : > { %v493_v34 = vadd.f32 %v492_v33, %v491_v30  ;;  %v518_v36 = vrot.slane %v517_v35, 4  ;;  %v510_v41 = vstv %s685_s17 }
 0x21f   : > { %490 = vst.msk [vmem:[%s844_s8] sm:$0x1] %vm292_vm10, %v488_v32 }
 0x220   : > { %494 = vst.msk [vmem:[%s858_s11] sm:$0x1] %vm292_vm10, %v493_v34  ;;  %v519_v37 = vadd.f32 %v518_v36, %v517_v35 }
 0x222   : > { %v520_v38 = vrot.slane %v519_v37, 2 }
 0x224   : > { %v521_v39 = vadd.f32 %v520_v38, %v519_v37 }
 0x226   : > { %v498_v40 = vld [vmem:[%s844_s8] sm:$0x1]  ;;  %v522_v43 = vrot.slane %v521_v39, 1 }
 0x227   : > { %v511_v42 = vsub.f32 %v498_v40, %v510_v41 }
 0x228   : > { %v523_v44 = vadd.f32 %v522_v43, %v521_v39 }
 0x229   : > { %512 = vst.msk [vmem:[%s844_s8] sm:$0x1] %vm292_vm10, %v511_v42 }
 0x22a   : > { %686 = vpush %v523_v44 }
 0x25b   : > { %s687_s18 = spop %686 }
 0x25c   : > { %v525_v46 = vstv %s687_s18 }
 0x25d   : > { %v526_v47 = vadd.f32 %v525_v46, %v513_v45 }
 0x25f   : > { %527 = vst.msk [vmem:[%s867_s14] sm:$0x1] %vm292_vm10, %v526_v47 }
 0x260 PF: > { %s16_s20 = sadd.s32 1, %s746_s20   ;;  %s902_s18 = smov %s742_s19 }
 0x261   : > { %p13_p5 = scmp.ge.s32.totalorder %s16_s20, 4   ;;  %s903_s19 = smov %s905_s21 }
 0x263   :  { %15 = sbr.rel (!%p13_p5) target bundleno = 2 (0x2), region = 97 }

</bundles_post_ra>
